<compile_context>
chip_gen: v5e
topology: v5e:2x2
jax: 0.10.0
libtpu: 0.0.40
codegen_flags: <defaults>
</compile_context>

<pallas_src>
import functools

import jax
import jax.numpy as jnp
from jax.experimental import pallas as pl
from jax.experimental.pallas import tpu as pltpu


def _gumbel_kernel(temp_ref, logits_ref, u_ref, w_ref, p_ref):
    """Soft Gumbel-Softmax over the last (task) axis + sigmoid of the logits.

    temp_ref   : SMEM (1,)  f32   temperature
    logits_ref : VMEM (R,n) f32   logits (task axis on lanes)
    u_ref      : VMEM (R,n) f32   uniform noise in [0, 1)
    w_ref      : VMEM (R,n) f32   gumbel-softmax weights (out)
    p_ref      : VMEM (R,n) f32   sigmoid probabilities (out)
    """
    temp = temp_ref[0]
    eps = jnp.float32(1e-20)

    # Gumbel(0,1) noise: g = -log(-log(U + eps) + eps)
    u = u_ref[...]
    g = -jnp.log(-jnp.log(u + eps) + eps)

    logits = logits_ref[...]

    # Numerically stable soft gumbel-softmax over the lane (task) dimension.
    y = (logits + g) / temp
    y = y - jnp.max(y, axis=-1, keepdims=True)
    e = jnp.exp(y)
    w_ref[...] = e / jnp.sum(e, axis=-1, keepdims=True)

    # Sigmoid probability of the (noise-free) logits.
    p_ref[...] = 1.0 / (1.0 + jnp.exp(-logits))


def _gumbel_pallas(temp_arr, logits, u):
    r, n = logits.shape
    return pl.pallas_call(
        _gumbel_kernel,
        out_shape=(
            jax.ShapeDtypeStruct((r, n), jnp.float32),
            jax.ShapeDtypeStruct((r, n), jnp.float32),
        ),
        in_specs=[
            pl.BlockSpec(memory_space=pltpu.MemorySpace.SMEM),  # temp (1,)
            pl.BlockSpec(memory_space=pltpu.MemorySpace.VMEM),  # logits (r, n)
            pl.BlockSpec(memory_space=pltpu.MemorySpace.VMEM),  # uniform (r, n)
        ],
        out_specs=(
            pl.BlockSpec(memory_space=pltpu.MemorySpace.VMEM),
            pl.BlockSpec(memory_space=pltpu.MemorySpace.VMEM),
        ),
    )(temp_arr, logits, u)


@jax.jit
def _gumbel_forward(logits, temp, key):
    """Fully-jitted forward: noise gen + pallas kernel + output transpose."""
    logits = logits.astype(jnp.float32)
    u = jax.random.uniform(key, logits.shape, dtype=jnp.float32)
    temp_arr = jnp.reshape(jnp.asarray(temp, dtype=jnp.float32), (1,))
    w, p = _gumbel_pallas(temp_arr, logits, u)
    # PyTorch returns .transpose(0, 1): (rows, n) -> (n, rows).
    return jnp.swapaxes(w, 0, 1), jnp.swapaxes(p, 0, 1)


class TaskSpecificGumbel:
    """JAX/Pallas port of the PyTorch `task_specific_gumbel` module."""

    def __init__(self, d_task):
        # nn.init.constant_(..., 0.0) for both parameters, shape (1, d_task-1)
        self.gumbel = jnp.zeros((1, d_task - 1), dtype=jnp.float32)
        self.gumbel_w = jnp.zeros((1, d_task - 1), dtype=jnp.float32)

    def __call__(self, temp, gumbel_type, key):
        if gumbel_type == "feature":
            logits = self.gumbel
        elif gumbel_type == "classifier":
            logits = self.gumbel_w
        else:
            raise ValueError("gumbel_type must be 'feature' or 'classifier'")
        return _gumbel_forward(logits, jnp.float32(temp), key)

    def forward_both(self, temp, key):
        """Compute both 'feature' and 'classifier' gumbels in ONE pallas_call.

        Returns ((w_feat, p_feat), (w_clf, p_clf)), each of shape (d_task-1, 1).
        """
        logits = jnp.concatenate([self.gumbel, self.gumbel_w], axis=0)  # (2, n)
        w, p = _gumbel_forward(logits, jnp.float32(temp), key)          # (n, 2)
        return (w[:, 0:1], p[:, 0:1]), (w[:, 1:2], p[:, 1:2])


if __name__ == "__main__":
    d_task = 8  # small synthetic task count -> logits shape (1, 7)
    temp = 0.5

    key = jax.random.PRNGKey(0)
    key_a, key_b = jax.random.split(key)

    module = TaskSpecificGumbel(d_task)

    # Standard single-type forward (matches the PyTorch module call signature).
    weights, probability = module(temp, "feature", key_a)
    jax.block_until_ready((weights, probability))

    assert weights.shape == (d_task - 1, 1)
    assert probability.shape == (d_task - 1, 1)
    assert weights.dtype == jnp.float32 and probability.dtype == jnp.float32
    # gumbel-softmax weights must sum to 1; sigmoid(0) = 0.5 for zero-init logits
    assert abs(float(jnp.sum(weights)) - 1.0) < 1e-5
    assert abs(float(probability[0, 0]) - 0.5) < 1e-6

    # Fused path: both parameter sets in a single pallas_call.
    (w_f, p_f), (w_c, p_c) = module.forward_both(temp, key_b)
    jax.block_until_ready((w_f, p_f, w_c, p_c))
    assert w_f.shape == (d_task - 1, 1) and w_c.shape == (d_task - 1, 1)
    assert abs(float(jnp.sum(w_f)) - 1.0) < 1e-5
    assert abs(float(jnp.sum(w_c)) - 1.0) < 1e-5
    assert abs(float(p_c[0, 0]) - 0.5) < 1e-6

    print("KERNEL_OK")
</pallas_src>

<mosaic_0001>
module attributes {stable_mosaic.version = 11 : i64} {
  func.func @_gumbel_kernel(%arg0: memref<1xf32, #tpu.memory_space<smem>>, %arg1: memref<1x7xf32, #tpu.memory_space<vmem>>, %arg2: memref<1x7xf32, #tpu.memory_space<vmem>>, %arg3: memref<1x7xf32, #tpu.memory_space<vmem>>, %arg4: memref<1x7xf32, #tpu.memory_space<vmem>>) attributes {dimension_semantics = [], scalar_prefetch = 0 : i64, scratch_operands = 0 : i64, tpu.core_type = #tpu.core_type<tc>} {
    %c0 = arith.constant 0 : index
    %0 = memref.load %arg0[%c0] : memref<1xf32, #tpu.memory_space<smem>>
    %c0_0 = arith.constant 0 : index
    %c0_1 = arith.constant 0 : index
    %1 = vector.load %arg2[%c0_0, %c0_1] : memref<1x7xf32, #tpu.memory_space<vmem>>, vector<1x7xf32>
    %cst = arith.constant 9.99999968E-21 : f32
    %2 = vector.broadcast %cst : f32 to vector<1x7xf32>
    %3 = arith.addf %1, %2 : vector<1x7xf32>
    %4 = math.log %3 : vector<1x7xf32>
    %cst_2 = arith.constant 0.000000e+00 : f32
    %5 = vector.broadcast %cst_2 : f32 to vector<1x7xf32>
    %6 = arith.subf %5, %4 : vector<1x7xf32>
    %cst_3 = arith.constant 9.99999968E-21 : f32
    %7 = vector.broadcast %cst_3 : f32 to vector<1x7xf32>
    %8 = arith.addf %6, %7 : vector<1x7xf32>
    %9 = math.log %8 : vector<1x7xf32>
    %cst_4 = arith.constant 0.000000e+00 : f32
    %10 = vector.broadcast %cst_4 : f32 to vector<1x7xf32>
    %11 = arith.subf %10, %9 : vector<1x7xf32>
    %c0_5 = arith.constant 0 : index
    %c0_6 = arith.constant 0 : index
    %12 = vector.load %arg1[%c0_5, %c0_6] : memref<1x7xf32, #tpu.memory_space<vmem>>, vector<1x7xf32>
    %13 = arith.addf %12, %11 : vector<1x7xf32>
    %14 = vector.broadcast %0 : f32 to vector<1x7xf32>
    %15 = arith.divf %13, %14 : vector<1x7xf32>
    %cst_7 = arith.constant dense<0xFF800000> : vector<1xf32>
    %16 = vector.multi_reduction <maximumf>, %15, %cst_7 [1] : vector<1x7xf32> to vector<1xf32>
    %17 = vector.shape_cast %16 : vector<1xf32> to vector<1x1xf32>
    %18 = vector.broadcast %17 : vector<1x1xf32> to vector<1x7xf32>
    %19 = arith.subf %15, %18 : vector<1x7xf32>
    %20 = math.exp %19 : vector<1x7xf32>
    %cst_8 = arith.constant dense<0.000000e+00> : vector<1xf32>
    %21 = vector.multi_reduction <add>, %20, %cst_8 [1] : vector<1x7xf32> to vector<1xf32>
    %22 = vector.shape_cast %21 : vector<1xf32> to vector<1x1xf32>
    %23 = vector.broadcast %22 : vector<1x1xf32> to vector<1x7xf32>
    %24 = arith.divf %20, %23 : vector<1x7xf32>
    %c0_9 = arith.constant 0 : index
    %c0_10 = arith.constant 0 : index
    %25 = vector.load %arg3[%c0_9, %c0_10] : memref<1x7xf32, #tpu.memory_space<vmem>>, vector<1x7xf32>
    tpu.vector_store %arg3[%c0_9, %c0_10], %24 {strides = array<i32>} : memref<1x7xf32, #tpu.memory_space<vmem>>, vector<1x7xf32>,
    %cst_11 = arith.constant 0.000000e+00 : f32
    %26 = vector.broadcast %cst_11 : f32 to vector<1x7xf32>
    %27 = arith.subf %26, %12 : vector<1x7xf32>
    %28 = math.exp %27 : vector<1x7xf32>
    %cst_12 = arith.constant 1.000000e+00 : f32
    %29 = vector.broadcast %cst_12 : f32 to vector<1x7xf32>
    %30 = arith.addf %29, %28 : vector<1x7xf32>
    %cst_13 = arith.constant 1.000000e+00 : f32
    %31 = vector.broadcast %cst_13 : f32 to vector<1x7xf32>
    %32 = arith.divf %31, %30 : vector<1x7xf32>
    %c0_14 = arith.constant 0 : index
    %c0_15 = arith.constant 0 : index
    %33 = vector.load %arg4[%c0_14, %c0_15] : memref<1x7xf32, #tpu.memory_space<vmem>>, vector<1x7xf32>
    tpu.vector_store %arg4[%c0_14, %c0_15], %32 {strides = array<i32>} : memref<1x7xf32, #tpu.memory_space<vmem>>, vector<1x7xf32>,
    return
  }
}

</mosaic_0001>

<bundles_post_ra>
// kernel: _gumbel_forward.1
= control target key start
LH: loop header
LB: loop body
LE: loop exit
PB: predicated region body
PF: predicated region fallthrough
CT: control target
= control target key end

     0   :  { %11 = vsyncpa [#allocation4], 0  ;;  %s239_s0 = inlined_call_operand.<no memory space> [shape: f32[1], index: 0, kind: input, shape index: {}]   ;;  %s240_s1 = inlined_call_operand.vmem [shape: f32[1,7], index: 1, kind: input, shape index: {}]   ;;  %s241_s2 = inlined_call_operand.vmem [shape: f32[1,7], index: 2, kind: input, shape index: {}]   ;;  %s242_s3 = inlined_call_operand.hbm [shape: f32[1,7], index: 3, kind: output, shape index: {0}]   ;;  %s243_s4 = inlined_call_operand.hbm [shape: f32[1,7], index: 4, kind: output, shape index: {1}]  }
   0x1   :  { %v20_v0 = vld [vmem:[%s241_s2] sm:$0x1]  ;;  %v31_v1 = vstv %s239_s0 }
   0x2   :  { %v21_v2 = vadd.f32 1e-20, %v20_v0  ;;  %127 = vrcp.f32 %v31_v1 }
   0x3   :  { %12 = vsyncpa [#allocation6], 0  ;;  %vm37_vm0 = vweird.f32 %v31_v1  ;;  %v43_v11 = vand.u32 2147483648, %v31_v1  ;;  %v41_v13 = vand.u32 2147483647, %v31_v1  ;;  %vm47_vm4 = vcmask 49152  }
   0x4   :  { %129 = vlog2.f32 %v21_v2  ;;  %v29_v18 = vld [vmem:[%s240_s1] sm:$0x1]  ;;  %s193_s1 = smov [#allocation5]   ;;  %s111_s22 = sshll.u32 %s243_s4, 4  ;;  %s112_s22 = int_to_ptr.hbm [resolvable:$true] %s111_s22 }
   0x5   :  { %v44_v15 = vor.u32 1.1754944e-38, %v43_v11  ;;  %vm42_vm3 = vcmp.eq.f32.partialorder %v41_v13, 8.507059e+37  ;;  %v73_v29 = vsub.f32 0.0, %v29_v18  ;;  %s109_s19 = sshll.u32 %s193_s1, 4  ;;  %s194_s4 = smov [#allocation3]   ;;  %s110_s19 = int_to_ptr.vmem [resolvable:$true] %s109_s19 }
   0x6   :  { %s98_s23 = sshll.u32 %s194_s4, 4  ;;  %s100_s26 = sshll.u32 %s242_s3, 4  ;;  %s99_s23 = int_to_ptr.vmem [resolvable:$true] %s98_s23  ;;  %s101_s26 = int_to_ptr.hbm [resolvable:$true] %s100_s26 }
   0x7   :  { %v74_v30 = vmul.f32 1.442695, %v73_v29 }
   0x8   :  { %v128_v3 = vpop.eup %127 }
   0x9   :  { %v33_v4 = vmul.f32 %v128_v3, %v31_v1  ;;  %vm38_vm1 = vweird.f32 %v128_v3 }
   0xa   :  { %v130_v5 = vpop.eup %129  ;;  %vm39_vm2 = vmor %vm37_vm0, %vm38_vm1 }
   0xb   :  { %v23_v6 = vmul.f32 0.6931472, %v130_v5  ;;  %v34_v7 = vsub.f32 1.0, %v33_v4 }
   0xd   :  { %v24_v8 = vsub.f32 0.0, %v23_v6  ;;  %v35_v10 = vmul.f32 %v128_v3, %v34_v7 }
   0xf   :  { %v25_v9 = vadd.f32 1e-20, %v24_v8  ;;  %v36_v12 = vadd.f32 %v128_v3, %v35_v10 }
  0x11   :  { %131 = vlog2.f32 %v25_v9  ;;  %v40_v17 = vsel %vm39_vm2, %v128_v3, %v36_v12 }
  0x12   :  { %v45_v20 = vsel %vm42_vm3, %v44_v15, %v40_v17 }
  0x17   :  { %v132_v14 = vpop.eup %131 }
  0x18   :  { %v27_v16 = vmul.f32 0.6931472, %v132_v14 }
  0x1a   :  { %v28_v19 = vsub.f32 0.0, %v27_v16 }
  0x1c   :  { %v30_v21 = vadd.f32 %v29_v18, %v28_v19 }
  0x1e   :  { %v46_v22 = vmul.f32 %v45_v20, %v30_v21 }
  0x20   :  { %v48_v23 = vsel %vm47_vm4, %v46_v22, -inf }
  0x21   :  { %49 = vmax.xlane.f32.xlu0 %v48_v23 }
  0x94   :  { %v50_v24 = vpop.xlane.xlu0 %49 }
  0x95   :  { %v51_v25 = vsub.f32 %v46_v22, %v50_v24 }
  0x97   :  { %v52_v26 = vmul.f32 1.442695, %v51_v25 }
  0x99   :  { %133 = vpow2.f32 %v52_v26 }
  0x9a   :  { %135 = vpow2.f32 %v74_v30 }
  0x9f   :  { %v134_v27 = vpop.eup %133 }
  0xa0   :  { %v54_v28 = vsel %vm47_vm4, %v134_v27, 0.0  ;;  %v136_v31 = vpop.eup %135 }
  0xa1   :  { %55 = vadd.xlane.f32.xlu0 %v54_v28  ;;  %v76_v32 = vadd.f32 1.0, %v136_v31 }
  0xa3   :  { %137 = vrcp.f32 %v76_v32  ;;  %v88_v37 = vand.u32 2147483648, %v76_v32  ;;  %vm82_vm5 = vweird.f32 %v76_v32  ;;  %v86_v39 = vand.u32 2147483647, %v76_v32 }
  0xa5   :  { %v89_v40 = vor.u32 1.1754944e-38, %v88_v37  ;;  %vm87_vm8 = vcmp.eq.f32.partialorder %v86_v39, 8.507059e+37 }
  0xa9   :  { %v138_v33 = vpop.eup %137 }
  0xaa   :  { %v78_v34 = vmul.f32 %v138_v33, %v76_v32  ;;  %vm83_vm6 = vweird.f32 %v138_v33 }
  0xab   :  { %vm84_vm7 = vmor %vm82_vm5, %vm83_vm6 }
  0xac   :  { %v79_v35 = vsub.f32 1.0, %v78_v34 }
  0xae   :  { %v80_v36 = vmul.f32 %v138_v33, %v79_v35 }
  0xb0   :  { %v81_v38 = vadd.f32 %v138_v33, %v80_v36 }
  0xb2   :  { %v85_v41 = vsel %vm84_vm7, %v138_v33, %v81_v38 }
  0xb3   :  { %v90_v42 = vsel %vm87_vm8, %v89_v40, %v85_v41 }
  0xb4   :  { %92 = vst.msk [vmem:[#allocation5] sm:$0x1] %vm47_vm4, %v90_v42 }
  0xb5   :  { %114 = dma.vmem_to_hbm [thread:$0]  %s110_s19, 16, %s112_s22, [#allocation6]  }
 0x114   :  { %v56_v43 = vpop.xlane.xlu0 %55 }
 0x115   :  { %139 = vrcp.f32 %v56_v43  ;;  %v68_v47 = vand.u32 2147483648, %v56_v43  ;;  %v66_v49 = vand.u32 2147483647, %v56_v43  ;;  %vm62_vm10 = vweird.f32 %v56_v43 }
 0x117   :  { %v69_v51 = vor.u32 1.1754944e-38, %v68_v47  ;;  %vm67_vm12 = vcmp.eq.f32.partialorder %v66_v49, 8.507059e+37 }
 0x11b   :  { %v140_v44 = vpop.eup %139 }
 0x11c   :  { %v58_v45 = vmul.f32 %v140_v44, %v56_v43  ;;  %vm63_vm9 = vweird.f32 %v140_v44 }
 0x11d   :  { %vm64_vm11 = vmor %vm62_vm10, %vm63_vm9 }
 0x11e   :  { %v59_v46 = vsub.f32 1.0, %v58_v45 }
 0x120   :  { %v60_v48 = vmul.f32 %v140_v44, %v59_v46 }
 0x122   :  { %v61_v50 = vadd.f32 %v140_v44, %v60_v48 }
 0x124   :  { %v65_v52 = vsel %vm64_vm11, %v140_v44, %v61_v50 }
 0x125   :  { %v70_v53 = vsel %vm67_vm12, %v69_v51, %v65_v52 }
 0x126   :  { %v71_v54 = vmul.f32 %v134_v27, %v70_v53 }
 0x128   :  { %72 = vst.msk [vmem:[#allocation3] sm:$0x1] %vm47_vm4, %v71_v54 }
 0x129   :  { %103 = dma.vmem_to_hbm [thread:$0]  %s99_s23, 16, %s101_s26, [#allocation4]  }
 0x12a   :  { %189 = dma.done.wait [#allocation4], 16  }
 0x12b   :  { %190 = vsyncadd [#allocation4], 4294967280 }
 0x12c   :  { %191 = dma.done.wait [#allocation6], 16  }
 0x12d   :  { %192 = vsyncadd [#allocation6], 4294967280 }
 0x12e   :  { %123 = vsyncpa [#allocation4], 1 }
 0x12f   :  { %124 = vsyncpa [#allocation6], 1 }

</bundles_post_ra>
